<compile_context>
chip_gen: v7x
topology: tpu7x:2x2x1
jax: 0.10.0
libtpu: 0.0.40
codegen_flags: <defaults>
</compile_context>

<pallas_src>
import functools
import math

import jax
import jax.numpy as jnp
from jax.experimental import pallas as pl
from jax.experimental.pallas import tpu as pltpu

EPS = 1e-5


def _layernorm_kernel(x_ref, w_ref, *rest, inv_d, d_real, apply_in_f32):
    """rest is (b_ref, o_ref) when bias is present, else (o_ref,)."""
    if len(rest) == 2:
        b_ref, o_ref = rest
    else:
        (o_ref,) = rest
        b_ref = None

    x_in = x_ref[...]                        # input dtype (possibly bf16)
    xf = x_in.astype(jnp.float32)
    d_pad = xf.shape[-1]

    # Two-pass statistics in f32 (centered variance, as PyTorch effectively does).
    mean = jnp.sum(xf, axis=-1, keepdims=True) * inv_d
    xc = xf - mean
    if d_pad != d_real:
        # Padded (zero) columns must not contribute to the centered variance.
        lane = jax.lax.broadcasted_iota(jnp.int32, xf.shape, xf.ndim - 1)
        xm = jnp.where(lane < d_real, xc, 0.0)
    else:
        xm = xc
    var = jnp.sum(xm * xm, axis=-1, keepdims=True) * inv_d
    inv = jax.lax.rsqrt(var + EPS)

    if apply_in_f32:
        # Params arrive pre-cast to f32 from the wrapper.
        y = xc * inv * w_ref[...]
        if b_ref is not None:
            y = y + b_ref[...]
        o_ref[...] = y.astype(o_ref.dtype)
    else:
        # bf16 apply chain (v6e/v7x): stats stay f32, per-tile casts are tiny
        # ((tm,1) and (1,D)); halves VPU work and live f32 footprint.
        cdt = o_ref.dtype
        y = (x_in - mean.astype(cdt)) * inv.astype(cdt) * w_ref[...]
        if b_ref is not None:
            y = y + b_ref[...]
        o_ref[...] = y


def _round_up(n, m):
    return ((n + m - 1) // m) * m


def _cdiv(a, b):
    return -(-a // b)


def _chip_flags():
    """(is_v5e, is_v7x) from the attached device; safe fallbacks if unknown."""
    try:
        dk = jax.devices()[0].device_kind.lower()
    except Exception:
        return False, False
    is_v5e = ("v5 lite" in dk) or ("v5e" in dk) or ("v5litepod" in dk)
    is_v7x = "v7" in dk
    return is_v5e, is_v7x


def _vmem_budget_bytes():
    # Headroom scales with capacity (12.5%, min 8 MiB) so the 64 MiB v7x part
    # keeps ~56 MiB usable; fallback assumes the smallest (64 MiB) chip so
    # AOT/mocked compiles never over-budget.
    try:
        cap = int(pltpu.get_tpu_info().vmem_capacity_bytes)
    except Exception:
        cap = 64 << 20
    headroom = max(8 << 20, cap // 8)
    return max(16 << 20, min(cap - headroom, 96 << 20))


def layer_norm(x, weight, bias=None):
    """x: (..., D); weight: (D,); bias: (D,) or None. Returns same shape/dtype as x."""
    orig_shape = x.shape
    D = orig_shape[-1]
    N = math.prod(orig_shape[:-1]) if len(orig_shape) > 1 else 1
    x2 = x.reshape(N, D)

    is_v5e, is_v7x = _chip_flags()

    # --- Lane-dense feature axis: pad D to a multiple of 128 -----------------
    D_pad = _round_up(D, 128)
    if D_pad != D:
        x2 = jnp.pad(x2, ((0, 0), (0, D_pad - D)))   # zero pads keep mean exact

    # Apply chain dtype: bf16 on bf16 inputs when the VPU supports it (not v5e).
    apply_in_f32 = not (x.dtype == jnp.bfloat16 and not is_v5e)
    param_dtype = jnp.float32 if apply_in_f32 else x.dtype

    w2 = weight.reshape(1, D).astype(param_dtype)
    has_bias = bias is not None
    if has_bias:
        b2 = bias.reshape(1, D).astype(param_dtype)
    if D_pad != D:
        w2 = jnp.pad(w2, ((0, 0), (0, D_pad - D)))
        if has_bias:
            b2 = jnp.pad(b2, ((0, 0), (0, D_pad - D)))

    # --- Row-tile sizing ------------------------------------------------------
    itemsize = jnp.dtype(x.dtype).itemsize
    align = max(8, 32 // itemsize)                 # 8 rows for f32, 16 for bf16
    vmem_budget = _vmem_budget_bytes()
    n_tmp = 2 if x.dtype == jnp.float32 else 3     # f32 astype is a no-op
    bytes_per_row = D_pad * (4 * itemsize + n_tmp * 4)
    tm_vmem = max(align, (vmem_budget // bytes_per_row) // align * align)

    # Per-step HBM-traffic floor keeps the ~0.35us/step grid overhead <~5%.
    step_bytes = (8 << 20) if is_v7x else (4 << 20)
    tm_floor = _round_up(_cdiv(step_bytes, 2 * D_pad * itemsize), align)
    base_cap = 512 if is_v5e else 1024             # v5e roofline saturates ~512
    tm = min(tm_vmem, max(base_cap, tm_floor))
    # Guarantee >= 2 grid steps so "parallel" can split rows across v7x's 2 TCs
    # (harmless extra step on single-TC chips).
    tm = min(tm, _round_up(_cdiv(N, 2), align))
    tm = max(align, tm)
    grid = (_cdiv(N, tm),)                         # partial last block: rows are
                                                   # independent; OOB rows masked.

    # vmem limit: actual resident estimate (double-buffered in/out + temps +
    # params) with generous margin, not the full budget.
    resident = (tm * D_pad * (4 * itemsize + n_tmp * 4)
                + 4 * D_pad * jnp.dtype(param_dtype).itemsize * (2 if has_bias else 1))
    vmem_limit = int(min(vmem_budget, max(2 * resident, 32 << 20)))

    in_specs = [
        pl.BlockSpec((tm, D_pad), lambda i: (i, 0)),
        pl.BlockSpec((1, D_pad), lambda i: (0, 0)),
    ]
    args = [x2, w2]
    if has_bias:
        in_specs.append(pl.BlockSpec((1, D_pad), lambda i: (0, 0)))
        args.append(b2)

    # TODO(synk): for extremely large D (block doesn't fit VMEM) add a second
    # ("arbitrary") grid axis over D with SMEM/VMEM stat accumulators.

    out = pl.pallas_call(
        functools.partial(
            _layernorm_kernel,
            inv_d=float(1.0 / D),          # 1/D_original, NOT 1/D_pad
            d_real=D,
            apply_in_f32=apply_in_f32,
        ),
        out_shape=jax.ShapeDtypeStruct((N, D_pad), x.dtype),
        grid_spec=pltpu.PrefetchScalarGridSpec(
            num_scalar_prefetch=0,
            grid=grid,
            in_specs=in_specs,
            out_specs=pl.BlockSpec((tm, D_pad), lambda i: (i, 0)),
        ),
        compiler_params=pltpu.CompilerParams(
            dimension_semantics=("parallel",),   # rows split over v7x's 2 TCs
            vmem_limit_bytes=vmem_limit,
        ),
    )(*args)

    if D_pad != D:
        out = out[:, :D]
    return out.reshape(orig_shape)


if __name__ == "__main__":
    key = jax.random.PRNGKey(0)
    kx, kw, kb = jax.random.split(key, 3)
    batch, seq, hidden = 2, 8, 32

    x = jax.random.normal(kx, (batch, seq, hidden), dtype=jnp.float32)
    # Non-trivial (but deterministic) affine params to exercise weight/bias paths.
    weight = 1.0 + 0.1 * jax.random.normal(kw, (hidden,), dtype=jnp.float32)
    bias = 0.1 * jax.random.normal(kb, (hidden,), dtype=jnp.float32)

    def ref_ln(x, w, b):
        mean = jnp.mean(x, axis=-1, keepdims=True)
        var = jnp.mean((x - mean) ** 2, axis=-1, keepdims=True)
        y = (x - mean) / jnp.sqrt(var + EPS) * w
        return y + b if b is not None else y

    # bias=True path (LayerNorm(ndim, bias=True))
    y = layer_norm(x, weight, bias)
    jax.block_until_ready(y)
    assert y.shape == x.shape and y.dtype == x.dtype
    assert jnp.max(jnp.abs(y - ref_ln(x, weight, bias))) < 1e-4, "bias path mismatch"

    # bias=False path (LayerNorm(ndim, bias=False))
    y_nb = layer_norm(x, weight, None)
    jax.block_until_ready(y_nb)
    assert jnp.max(jnp.abs(y_nb - ref_ln(x, weight, None))) < 1e-4, "no-bias path mismatch"

    print("KERNEL_OK")
</pallas_src>

<mosaic_0001>
module attributes {stable_mosaic.version = 11 : i64} {
  func.func @_layernorm_kernel(%arg0: i32, %arg1: memref<8x128xf32, #tpu.memory_space<vmem>>, %arg2: memref<1x128xf32, #tpu.memory_space<vmem>>, %arg3: memref<1x128xf32, #tpu.memory_space<vmem>>, %arg4: memref<8x128xf32, #tpu.memory_space<vmem>>) attributes {dimension_semantics = [#tpu.dimension_semantics<parallel>], iteration_bounds = array<i64: 2>, scalar_prefetch = 0 : i64, scratch_operands = 0 : i64, tpu.core_type = #tpu.core_type<tc>, window_params = [{transform_indices = @transform_0, window_bounds = array<i64: 8, 128>}, {pipeline_mode = #tpu.pipeline_mode<synchronous>, transform_indices = @transform_1, window_bounds = array<i64: 1, 128>}, {pipeline_mode = #tpu.pipeline_mode<synchronous>, transform_indices = @transform_2, window_bounds = array<i64: 1, 128>}, {transform_indices = @transform_3, window_bounds = array<i64: 8, 128>}]} {
    %c0 = arith.constant 0 : index
    %c0_0 = arith.constant 0 : index
    %0 = vector.load %arg1[%c0, %c0_0] : memref<8x128xf32, #tpu.memory_space<vmem>>, vector<8x128xf32>
    %cst = arith.constant dense<0.000000e+00> : vector<8xf32>
    %1 = vector.multi_reduction <add>, %0, %cst [1] : vector<8x128xf32> to vector<8xf32>
    %2 = vector.shape_cast %1 : vector<8xf32> to vector<8x1xf32>
    %cst_1 = arith.constant 3.125000e-02 : f32
    %3 = vector.broadcast %cst_1 : f32 to vector<8x1xf32>
    %4 = arith.mulf %2, %3 : vector<8x1xf32>
    %5 = vector.broadcast %4 : vector<8x1xf32> to vector<8x128xf32>
    %6 = arith.subf %0, %5 : vector<8x128xf32>
    %7 = tpu.iota {dimensions = array<i32: 1>} : vector<8x128xi32>
    %c32_i32 = arith.constant 32 : i32
    %8 = vector.broadcast %c32_i32 : i32 to vector<8x128xi32>
    %9 = arith.cmpi slt, %7, %8 : vector<8x128xi32>
    %cst_2 = arith.constant 0.000000e+00 : f32
    %10 = vector.broadcast %cst_2 : f32 to vector<8x128xf32>
    %11 = arith.select %9, %6, %10 : vector<8x128xi1>, vector<8x128xf32>
    %12 = arith.mulf %11, %11 : vector<8x128xf32>
    %cst_3 = arith.constant dense<0.000000e+00> : vector<8xf32>
    %13 = vector.multi_reduction <add>, %12, %cst_3 [1] : vector<8x128xf32> to vector<8xf32>
    %14 = vector.shape_cast %13 : vector<8xf32> to vector<8x1xf32>
    %cst_4 = arith.constant 3.125000e-02 : f32
    %15 = vector.broadcast %cst_4 : f32 to vector<8x1xf32>
    %16 = arith.mulf %14, %15 : vector<8x1xf32>
    %cst_5 = arith.constant 9.99999974E-6 : f32
    %17 = vector.broadcast %cst_5 : f32 to vector<8x1xf32>
    %18 = arith.addf %16, %17 : vector<8x1xf32>
    %19 = math.rsqrt %18 : vector<8x1xf32>
    %20 = vector.broadcast %19 : vector<8x1xf32> to vector<8x128xf32>
    %21 = arith.mulf %6, %20 : vector<8x128xf32>
    %c0_6 = arith.constant 0 : index
    %c0_7 = arith.constant 0 : index
    %22 = vector.load %arg2[%c0_6, %c0_7] : memref<1x128xf32, #tpu.memory_space<vmem>>, vector<1x128xf32>
    %23 = vector.broadcast %22 : vector<1x128xf32> to vector<8x128xf32>
    %24 = arith.mulf %21, %23 : vector<8x128xf32>
    %c0_8 = arith.constant 0 : index
    %c0_9 = arith.constant 0 : index
    %25 = vector.load %arg3[%c0_8, %c0_9] : memref<1x128xf32, #tpu.memory_space<vmem>>, vector<1x128xf32>
    %26 = vector.broadcast %25 : vector<1x128xf32> to vector<8x128xf32>
    %27 = arith.addf %24, %26 : vector<8x128xf32>
    %c0_10 = arith.constant 0 : index
    %c0_11 = arith.constant 0 : index
    %28 = vector.load %arg4[%c0_10, %c0_11] : memref<8x128xf32, #tpu.memory_space<vmem>>, vector<8x128xf32>
    tpu.vector_store %arg4[%c0_10, %c0_11], %27 {strides = array<i32>} : memref<8x128xf32, #tpu.memory_space<vmem>>, vector<8x128xf32>,
    return
  }
  func.func @transform_0(%arg0: i32) -> (i32, i32) {
    %c0_i32 = arith.constant 0 : i32
    %c0_i32_0 = arith.constant 0 : i32
    return %arg0, %c0_i32 : i32, i32
  }
  func.func @transform_1(%arg0: i32) -> (i32, i32) {
    %c0_i32 = arith.constant 0 : i32
    %c0_i32_0 = arith.constant 0 : i32
    %c0_i32_1 = arith.constant 0 : i32
    return %c0_i32, %c0_i32_0 : i32, i32
  }
  func.func @transform_2(%arg0: i32) -> (i32, i32) {
    %c0_i32 = arith.constant 0 : i32
    %c0_i32_0 = arith.constant 0 : i32
    %c0_i32_1 = arith.constant 0 : i32
    return %c0_i32, %c0_i32_0 : i32, i32
  }
  func.func @transform_3(%arg0: i32) -> (i32, i32) {
    %c0_i32 = arith.constant 0 : i32
    %c0_i32_0 = arith.constant 0 : i32
    return %arg0, %c0_i32 : i32, i32
  }
}

</mosaic_0001>

<bundles_post_ra>
// kernel: tpu_custom_call.1
= control target key start
LH: loop header
LB: loop body
LE: loop exit
PB: predicated region body
PF: predicated region fallthrough
CT: control target
= control target key end

     0   :  { %8 = vsyncpa [#allocation3], 0  ;;  %s652_s0 = inlined_call_operand.hbm [shape: f32[16,128], index: 0, kind: input, shape index: {}]   ;;  %s653_s1 = inlined_call_operand.vmem [shape: f32[1,128], index: 1, kind: input, shape index: {}]   ;;  %s654_s2 = inlined_call_operand.vmem [shape: f32[1,128], index: 2, kind: input, shape index: {}]   ;;  %s655_s3 = inlined_call_operand.hbm [shape: f32[16,128], index: 3, kind: output, shape index: {}]  }
   0x1   :  { %10 = vsyncpa [#allocation3 + $0x1], 0 }
   0x2   :  { %11 = vsyncpa [#allocation4], 0 }
   0x3   :  { %13 = vsyncpa [#allocation4 + $0x1], 0  ;;  %s485_s12 = smov 0   ;;  %s487_s13 = smov 0  }
   0x4   :  { %s489_s14 = smov 0   ;;  %s491_s15 = smov 0  }
   0x5 LB: > { %s506_s16 = sadd.s32 4294967295, %s461_s15   ;;  %s303_s17 = sadd.s32 4294967294, %s461_s15   ;;  %s461_s15 = sphi %s491_s15, %s670_s15   ;;  %s457_s14 = sphi %s489_s14, %s669_s14   ;;  %s453_s13 = sphi %s487_s13, %s668_s13   ;;  %s449_s12 = sphi %s485_s12, %s667_s12  }
   0x6   : > { %s510_s18 = sadd.s32 1, %s461_s15   ;;  %s26_s19 = sadd.s32 1, %s457_s14 }
   0x7   : > { %s23_s20 = ssub.s32 %s461_s15, %s510_s18  ;;  %p33_p0 = scmp.ne.s32.totalorder %s457_s14, %s453_s13 }
   0x8   : > { %p24_p1 = scmp.eq.s32.totalorder %s23_s20, 0  ;;  %p34_p2 = scmp.eq.s32.totalorder %s461_s15, 0 }
   0x9   : > { %p39_p3 = scmp.ne.s32.totalorder %s453_s13, %s449_s12  ;;  %p40_p4 = scmp.eq.s32.totalorder %s506_s16, 0 }
   0xa   : > { %s522_s21 = scalar_select %p24_p1, %s457_s14, %s26_s19  }
   0xb   : > { %p524_p5 = por %p34_p2, %p33_p0  ;;  %p528_p6 = por %p40_p4, %p39_p3 }
   0xc   : > { %p105_p7 = scmp.eq.s32.totalorder %s506_s16, 1  ;;  %p111_p8 = scmp.eq.s32.totalorder %s303_s17, 1 }
   0xd   : > { %p329_p10 = scmp.lt.s32.totalorder %s461_s15, 2  ;;  %s137_s26 = sand.u32 1, %s457_s14  }
   0xe   : > { %p535_p11 = por %p105_p7, %p33_p0  ;;  %p539_p12 = por %p111_p8, %p39_p3 }
   0xf   : > { %s307_s27 = sshll.u32 %s461_s15, 7  ;;  %s306_s28 = sshll.u32 %s137_s26, 3 }
  0x10   : > { %s659_s24 = scalar_select %p535_p11, 1, 0 }
  0x11   : > { %s660_s25 = scalar_select %p539_p12, 1, 0 }
  0x12   : > { %s548_s4 = scalar_lea.hbm %s652_s0, %s307_s27  ;;  %s141_s5 = scalar_lea.vmem [#allocation2], %s306_s28 }
  0x13   : > { %s148_s6 = sshll.u32 %s141_s5, 4  ;;  %p552_p13 = pnand %p329_p10, %p524_p5  ;;  %s556_s6 = int_to_ptr.vmem [resolvable:$true] %s148_s6 }
  0x14   : > { %s138_s8 = scalar_lea.sflag [#allocation3], %s137_s26  ;;  %s365_s9 = scalar_lea.hbm %s548_s4, 128 }
  0x15   : > { %p366_p2 = scmp.ne.s32.totalorder %s548_s4, %s365_s9  ;;  %p367_p3 = pneg %p552_p13 }
  0x16   : > { %s370_s17 = scalar_lea.hbm %s652_s0, 256  ;;  %p371_p5 = scmp.lt.u32.totalorder %s548_s4, %s652_s0 }
  0x17   : > { %p368_p4 = pnand %p367_p3, %p366_p2  ;;  %p372_p8 = scmp.lt.u32.totalorder %s370_s17, %s365_s9 }
  0x18   : > { %p374_p9 = scmp.lt.u32.totalorder %s365_s9, %s548_s4 }
  0x19   : > { %p369_p7 = pneg %p368_p4  ;;  %p373_p10 = por %p372_p8, %p371_p5 }
  0x1b   : > { %p375_p0 = por %p374_p9, %p373_p10 }
  0x1d   : > { %p376_p1 = pnand %p375_p0, %p369_p7 }
  0x1f   : > { %379 = shalt.err (!%p376_p1)
}
  0x20   : > { %s380_s22 = scalar_lea.vmem %s556_s6, 128  ;;  %s463_s26 = smov [#allocation2]  }
  0x21   : > { %p381_p2 = scmp.ne.s32.totalorder %s556_s6, %s380_s22  ;;  %s385_s27 = sshll.u32 %s463_s26, 4  ;;  %s386_s27 = int_to_ptr.vmem [resolvable:$false] %s385_s27 }
  0x22   : > { %s387_s28 = scalar_lea.vmem %s386_s27, 256  ;;  %p388_p11 = scmp.lt.s32.totalorder %s556_s6, %s386_s27 }
  0x23   : > { %p383_p4 = pnand %p381_p2, %p367_p3  ;;  %p389_p5 = scmp.lt.s32.totalorder %s387_s28, %s380_s22 }
  0x25   : > { %p384_p12 = pneg %p383_p4  ;;  %p390_p8 = por %p389_p5, %p388_p11 }
  0x27   : > { %p391_p9 = pnand %p390_p8, %p384_p12 }
  0x29   : > { %394 = shalt.err (!%p391_p9)
}
  0x2a   : > { %324 = dma.hbm_to_vmem [thread:$0]  (!%p552_p13), %s548_s4, 128, %s556_s6, %s138_s8  }
  0x2b   : > { %p662_p0 = scmp.lt.s32.totalorder %s461_s15, 3  ;;  %p663_p1 = scmp.ge.s32.totalorder %s461_s15, 1 }
  0x2d   : > { %p154_p3 = pnand %p663_p1, %p662_p0 }
  0x2e   : > { %s590_s29 = sand.u32 (!%p154_p3), 1, %s453_s13  }
  0x2f   : > { %157 = sbr.rel (%p154_p3) target bundleno = 382 (0x17e), region = 32  ;;  %s309_s30 = sshll.u32 (!%p154_p3), %s590_s29, 3 }
  0x30   : > { %s160_s5 = scalar_lea.sflag (!%p154_p3), [#allocation3], %s590_s29  ;;  %s163_s9 = scalar_lea.vmem (!%p154_p3), [#allocation2], %s309_s30 }
  0x36   : > { %440 = dma.done.wait (%p528_p6), %s160_s5, 128  }
  0x37   : > { %442 = vsyncadd (%p528_p6), %s160_s5, 4294967168  ;;  %v186_v0 = vld [vmem:[%s163_s9] sm:$0xff]  ;;  %v191_v1 = vlaneseq  ;;  %s314_s8 = sshll.u32 %s506_s16, 7  ;;  %s185_s10 = scalar_lea.vmem [#allocation5], %s309_s30 }
  0x38   : > { %187 = vadd.xlane.f32.xlu0 %v186_v0  ;;  %v311_v12 = vld [vmem:[%s653_s1] ss:$0 sm:$0xff]  ;;  %s233_s11 = sshll.u32 %s185_s10, 4  ;;  %s608_s20 = scalar_lea.hbm %s655_s3, %s314_s8  ;;  %s610_s11 = int_to_ptr.vmem [resolvable:$true] %s233_s11 }
  0x39   : > { %v192_v2 = vand.u32 127, %v191_v1  ;;  %v312_v14 = vld [vmem:[%s654_s2] ss:$0 sm:$0xff]  ;;  %s220_s22 = scalar_lea.sflag [#allocation4], %s590_s29  ;;  %s395_s26 = scalar_lea.vmem %s610_s11, 128 }
  0x3a   : > { %p396_p6 = scmp.ne.s32.totalorder %s610_s11, %s395_s26  ;;  %p664_p11 = scmp.ne.s32.totalorder %s659_s24, 0 }
  0x3b   : > { %vm193_vm0 = vcmp.lt.s32.totalorder %v192_v2, 32  ;;  %s464_s16 = smov [#allocation5]  }
  0x3c   : > { %p397_p12 = pnand %p396_p6, %p664_p11  ;;  %s399_s27 = sshll.u32 %s464_s16, 4  ;;  %s400_s27 = int_to_ptr.vmem [resolvable:$false] %s399_s27 }
  0x3d   : > { %s401_s28 = scalar_lea.vmem %s400_s27, 256  ;;  %p402_p7 = scmp.lt.s32.totalorder %s610_s11, %s400_s27 }
  0x3e   : > { %p398_p13 = pneg %p397_p12  ;;  %p403_p10 = scmp.lt.s32.totalorder %s401_s28, %s395_s26 }
  0x40   : > { %p404_p2 = por %p403_p10, %p402_p7 }
  0x42   : > { %p405_p4 = pnand %p404_p2, %p398_p13 }
  0xc5   : > { %v188_v3 = vpop.xlane.xlu0 %187 }
  0xc6   : > { %v189_v4 = vmul.f32 0.03125, %v188_v3 }
  0xc8   : > { %v190_v5 = vsub.f32 %v186_v0, %v189_v4 }
  0xca   : > { %v194_v6 = vsel %vm193_vm0, %v190_v5, 0.0 }
  0xcb   : > { %v195_v7 = vmul.f32 %v194_v6, %v194_v6 }
  0xcd   : > { %196 = vadd.xlane.f32.xlu0 %v195_v7 }
 0x15a   : > { %v197_v8 = vpop.xlane.xlu0 %196 }
 0x15b   : > { %v198_v9 = vmul.f32 0.03125, %v197_v8 }
 0x15d   : > { %v199_v10 = vadd.f32 1e-05, %v198_v9 }
 0x15f   : > { %363 = vrsqrt.f32 %v199_v10 }
 0x169   : > { %v364_v11 = vpop.eup %363 }
 0x16a   : > { %v201_v13 = vmul.f32 %v364_v11, %v190_v5 }
 0x16c   : > { %v209_v15 = vmul.f32 %v311_v12, %v201_v13 }
 0x16e   : > { %v217_v16 = vadd.f32 %v312_v14, %v209_v15 }
 0x170   : > { %218 = vst [vmem:[%s185_s10] sm:$0xff] %v217_v16 }
 0x171   : > { %408 = shalt.err (!%p405_p4)
}
 0x172   : > { %s409_s29 = scalar_lea.hbm %s608_s20, 128  ;;  %s413_s9 = scalar_lea.hbm %s655_s3, 256 }
 0x173   : > { %p410_p5 = scmp.ne.s32.totalorder %s608_s20, %s409_s29  ;;  %p414_p0 = scmp.lt.u32.totalorder %s608_s20, %s655_s3 }
 0x174   : > { %p415_p1 = scmp.lt.u32.totalorder %s413_s9, %s409_s29  ;;  %p417_p6 = scmp.lt.u32.totalorder %s409_s29, %s608_s20 }
 0x175   : > { %p411_p8 = pnand %p410_p5, %p664_p11 }
 0x176   : > { %p416_p3 = por %p415_p1, %p414_p0 }
 0x177   : > { %p412_p9 = pneg %p411_p8 }
 0x178   : > { %p418_p12 = por %p417_p6, %p416_p3 }
 0x17a   : > { %p419_p13 = pnand %p418_p12, %p412_p9 }
 0x17c   : > { %422 = shalt.err (!%p419_p13)
}
 0x17d   : > { %319 = dma.vmem_to_hbm [thread:$0]  (%p664_p11), %s610_s11, 128, %s608_s20, %s220_s22  }
 0x17e PF: > { %s245_s6 = sand.u32 1, %s449_s12   ;;  %p665_p7 = scmp.ne.s32.totalorder %s660_s25, 0 }
 0x17f   : > { %p666_p10 = scmp.ge.s32.totalorder %s461_s15, 2  ;;  %s246_s7 = scalar_lea.sflag [#allocation4], %s245_s6 }
 0x181   : > { %p326_p2 = pnand %p666_p10, %p665_p7 }
 0x183   : > { %444 = dma.done.wait (!%p326_p2), %s246_s7, 128  }
 0x184   : > { %446 = vsyncadd (!%p326_p2), %s246_s7, 4294967168  ;;  %p16_p4 = scmp.ge.s32.totalorder %s510_s18, 4   ;;  %s667_s12 = smov %s453_s13 }
 0x185   : > { %s668_s13 = smov %s457_s14  ;;  %s669_s14 = smov %s522_s21 }
 0x186   : > { %s670_s15 = smov %s510_s18  ;;  %18 = sbr.rel (!%p16_p4) target bundleno = 5 (0x5), region = 77 }
 0x18d   :  { %251 = vsyncpa [#allocation3], 1 }
 0x18e   :  { %253 = vsyncpa [#allocation3 + $0x1], 1 }
 0x18f   :  { %254 = vsyncpa [#allocation4], 1 }
 0x190   :  { %256 = vsyncpa [#allocation4 + $0x1], 1 }

</bundles_post_ra>
